<compile_context>
chip_gen: v7x
topology: tpu7x:2x2x1
jax: 0.10.0
libtpu: 0.0.40
codegen_flags: <defaults>
</compile_context>

<pallas_src>
import jax
import jax.numpy as jnp
from jax.experimental import pallas as pl
from jax.experimental.pallas import tpu as pltpu


def _round_up(x, m):
    return ((x + m - 1) // m) * m


# ---------------------------------------------------------------------------
# Kernels
# ---------------------------------------------------------------------------
def _lora_kernel_full_k(x_ref, wt_ref, bias_ref, down_ref, bt_ref, o_ref):
    """Collapsed-K variant: grid (i, j); no accumulator scratch, single store."""
    acc = jnp.dot(x_ref[...], wt_ref[...], preferred_element_type=jnp.float32)
    acc = acc + jnp.dot(down_ref[...], bt_ref[...], preferred_element_type=jnp.float32)
    o_ref[...] = (acc + bias_ref[...].astype(jnp.float32)).astype(o_ref.dtype)


def _lora_kernel_tiled_k(x_ref, wt_ref, bias_ref, down_ref, bt_ref, o_ref, acc_ref):
    """K-tiled variant: f32 accumulator, bias folded into init, LoRA-up in finalize."""
    k = pl.program_id(2)

    @pl.when(k == 0)
    def _init():
        acc_ref[...] = jnp.broadcast_to(bias_ref[...].astype(jnp.float32),
                                        acc_ref.shape)

    acc_ref[...] += jnp.dot(x_ref[...], wt_ref[...],
                            preferred_element_type=jnp.float32)

    @pl.when(k == pl.num_programs(2) - 1)
    def _finalize():
        up = jnp.dot(down_ref[...], bt_ref[...], preferred_element_type=jnp.float32)
        o_ref[...] = (acc_ref[...] + up).astype(o_ref.dtype)


# ---------------------------------------------------------------------------
# VMEM budgeting
# ---------------------------------------------------------------------------
def _vmem_capacity_bytes():
    cap = 64 * 1024 * 1024  # conservative fallback (v7x per-TC)
    try:
        info = pltpu.get_tpu_info()
        cap = int(getattr(info, "vmem_capacity_bytes", cap))
    except Exception:
        pass
    return cap


def _footprint_bytes(tm, tn, tk, r_pad, *, out_bytes, tiled_k):
    in_b = 2  # bf16 operands
    fp = 2 * tm * tk * in_b        # x slab (double-buffered)
    fp += 2 * tk * tn * in_b       # W^T slab
    fp += 2 * 1 * tn * 4           # bias row (f32)
    fp += 2 * tm * r_pad * in_b    # LoRA-down activations
    fp += 2 * r_pad * tn * in_b    # B^T tile
    fp += 2 * tm * tn * out_bytes  # output tile
    if tiled_k:
        fp += tm * tn * 4          # f32 accumulator scratch
    return fp


# ---------------------------------------------------------------------------
# Parameter packing (done ONCE, at load time — hoisted out of the hot path)
# ---------------------------------------------------------------------------
def prepare_lora_linear(w, b, a_down, b_up, rank, *,
                        tm=512, tn=512, tk=512,
                        compute_dtype=jnp.bfloat16):
    """w: (OUT, IN); b: (OUT,) or None; a_down: (R, IN); b_up: (OUT, R)."""
    if rank <= 0:
        raise ValueError("LoRA rank must be >= 1")
    out_f, in_f = w.shape

    vmem_cap = _vmem_capacity_bytes()
    budget = int(0.70 * vmem_cap)   # resident-bytes cap (v7x: ~45 MiB, v5e/v6e: ~90 MiB)
    out_bytes = 4                   # conservative (f32 output tiles)

    r_pad = _round_up(rank, 128)    # lane-dense LoRA rank (same # MXU passes as rank<256)

    # --- N tiling ---
    if out_f <= tn:
        tn = out_f
        out_pad = out_f
    else:
        out_pad = _round_up(out_f, tn)

    # --- K tiling: prefer the collapsed-K fast path when it fits the VMEM budget ---
    if in_f <= 8192 and _footprint_bytes(tm, tn, in_f, r_pad,
                                         out_bytes=out_bytes,
                                         tiled_k=False) <= budget:
        tk = in_f
        in_pad = in_f
        tiled_k = False
    else:
        tk = min(tk, in_f)
        while (tk > 256 and
               _footprint_bytes(tm, tn, tk, r_pad, out_bytes=out_bytes,
                                tiled_k=True) > budget):
            tk //= 2
        in_pad = _round_up(in_f, tk)
        tiled_k = True

    # --- Pack weights: transpose + pad + cast, once ---
    wt = jnp.zeros((in_pad, out_pad), compute_dtype).at[:in_f, :out_f].set(
        jnp.transpose(w).astype(compute_dtype))
    at = jnp.zeros((in_pad, r_pad), compute_dtype).at[:in_f, :rank].set(
        jnp.transpose(a_down).astype(compute_dtype))
    bt = jnp.zeros((r_pad, out_pad), compute_dtype).at[:rank, :out_f].set(
        jnp.transpose(b_up).astype(compute_dtype))
    bias2d = jnp.zeros((1, out_pad), jnp.float32)
    if b is not None:
        bias2d = bias2d.at[0, :out_f].set(b.astype(jnp.float32))

    return dict(wt=wt, at=at, bt=bt, bias=bias2d,
                in_features=in_f, out_features=out_f, rank=rank,
                in_pad=in_pad, out_pad=out_pad, r_pad=r_pad,
                tm=tm, tn=tn, tk=tk, tiled_k=tiled_k,
                compute_dtype=compute_dtype,
                vmem_limit_bytes=int(0.85 * vmem_cap))


# ---------------------------------------------------------------------------
# Per-call forward
# ---------------------------------------------------------------------------
def lora_linear_apply(x, params):
    """y = x @ W^T + b + (1/rank) * (x @ A^T) @ B^T, x: (..., IN) -> (..., OUT)."""
    in_f = params["in_features"]
    out_f = params["out_features"]
    in_pad = params["in_pad"]
    out_pad = params["out_pad"]
    r_pad = params["r_pad"]
    tn = params["tn"]
    tk = params["tk"]
    tiled_k = params["tiled_k"]
    cdt = params["compute_dtype"]

    orig_shape = x.shape
    x2d = x.reshape(-1, in_f)
    m = x2d.shape[0]

    tm = min(params["tm"], _round_up(m, 16))   # bf16 sublane packing: multiples of 16
    m_pad = _round_up(m, tm)

    xp = x2d.astype(cdt)
    if m_pad != m or in_pad != in_f:
        xp = jnp.pad(xp, ((0, m_pad - m), (0, in_pad - in_f)))

    # LoRA-down pre-pass (tiny: M x IN x r_pad), f32 accumulation, 1/rank folded in.
    # NOTE: the down intermediate is rounded to bf16 for the small up-projection; keep
    # it f32 here if tighter numerics vs the f32 PyTorch module are required.
    inv_rank = 1.0 / params["rank"]
    down = (jnp.dot(xp, params["at"], preferred_element_type=jnp.float32)
            * inv_rank).astype(cdt)

    grid_m = m_pad // tm
    grid_n = out_pad // tn

    if not tiled_k:
        grid = (grid_m, grid_n)
        in_specs = [
            pl.BlockSpec((tm, in_pad), lambda i, j: (i, 0)),   # x row slab (resident over j)
            pl.BlockSpec((in_pad, tn), lambda i, j: (0, j)),   # W^T column slab
            pl.BlockSpec((1, tn), lambda i, j: (0, j)),        # bias row
            pl.BlockSpec((tm, r_pad), lambda i, j: (i, 0)),    # LoRA-down activations
            pl.BlockSpec((r_pad, tn), lambda i, j: (0, j)),    # B^T tile
        ]
        out_specs = pl.BlockSpec((tm, tn), lambda i, j: (i, j))
        scratch = []
        kernel = _lora_kernel_full_k
        dims = ("parallel", "parallel")
    else:
        grid = (grid_m, grid_n, in_pad // tk)
        in_specs = [
            pl.BlockSpec((tm, tk), lambda i, j, k: (i, k)),
            pl.BlockSpec((tk, tn), lambda i, j, k: (k, j)),
            pl.BlockSpec((1, tn), lambda i, j, k: (0, j)),
            pl.BlockSpec((tm, r_pad), lambda i, j, k: (i, 0)),
            pl.BlockSpec((r_pad, tn), lambda i, j, k: (0, j)),
        ]
        out_specs = pl.BlockSpec((tm, tn), lambda i, j, k: (i, j))
        scratch = [pltpu.VMEM((tm, tn), jnp.float32)]
        kernel = _lora_kernel_tiled_k
        dims = ("parallel", "parallel", "arbitrary")

    out = pl.pallas_call(
        kernel,
        out_shape=jax.ShapeDtypeStruct((m_pad, out_pad), x.dtype),
        grid_spec=pltpu.PrefetchScalarGridSpec(
            num_scalar_prefetch=0,
            grid=grid,
            in_specs=in_specs,
            out_specs=out_specs,
            scratch_shapes=scratch,
        ),
        compiler_params=pltpu.CompilerParams(
            dimension_semantics=dims,
            vmem_limit_bytes=params["vmem_limit_bytes"],
        ),
    )(xp, params["wt"], params["bias"], down, params["bt"])

    out = out[:m, :out_f]
    return out.reshape(orig_shape[:-1] + (out_f,))


def lora_linear(x, w, b, a_down, b_up, rank, **kwargs):
    """Convenience one-shot wrapper (prefer prepare once + apply per call)."""
    return lora_linear_apply(x, prepare_lora_linear(w, b, a_down, b_up, rank, **kwargs))


# ---------------------------------------------------------------------------
# Demo / correctness check
# ---------------------------------------------------------------------------
if __name__ == "__main__":
    # Small shapes consistent with the module's forward: (batch, seq, in_features)
    batch, seq, in_features, out_features, rank = 2, 8, 32, 32, 4

    key = jax.random.PRNGKey(0)
    kx, kw, kb, kdown, kup = jax.random.split(key, 5)

    x = jax.random.normal(kx, (batch, seq, in_features), dtype=jnp.float32)

    # Parameters mirroring the PyTorch module's shapes / inits:
    w_pre = jax.random.normal(kw, (out_features, in_features), jnp.float32) * 0.1
    b_pre = jax.random.normal(kb, (out_features,), jnp.float32) * 0.1
    a_down = jax.random.normal(kdown, (rank, in_features), jnp.float32)   # std=1
    b_up = jnp.zeros((out_features, rank), jnp.float32)                   # zeros init

    def ref_fn(x_, w_, b_, a_, bu_):
        x2 = x_.reshape(-1, in_features)
        r = x2 @ w_.T + b_[None, :] + (1.0 / rank) * ((x2 @ a_.T) @ bu_.T)
        return r.reshape(batch, seq, out_features)

    # 1) Module-faithful init (lora_up zeros).
    params = prepare_lora_linear(w_pre, b_pre, a_down, b_up, rank)
    y = jax.block_until_ready(lora_linear_apply(x, params))
    assert jnp.allclose(y, ref_fn(x, w_pre, b_pre, a_down, b_up),
                        atol=3e-2, rtol=3e-2), "mismatch vs reference (zero lora_up)"

    # 2) Non-zero lora_up to exercise the LoRA path as well.
    b_up2 = jax.random.normal(kup, (out_features, rank), jnp.float32) * 0.1
    params2 = prepare_lora_linear(w_pre, b_pre, a_down, b_up2, rank)
    y2 = jax.block_until_ready(lora_linear_apply(x, params2))
    assert jnp.allclose(y2, ref_fn(x, w_pre, b_pre, a_down, b_up2),
                        atol=3e-2, rtol=3e-2), "mismatch vs reference (lora path)"

    print("KERNEL_OK")
</pallas_src>

<mosaic_0001>
module attributes {stable_mosaic.version = 11 : i64} {
  func.func @_lora_kernel_full_k(%arg0: i32, %arg1: i32, %arg2: memref<16x32xbf16, #tpu.memory_space<vmem>>, %arg3: memref<32x32xbf16, #tpu.memory_space<vmem>>, %arg4: memref<1x32xf32, #tpu.memory_space<vmem>>, %arg5: memref<16x128xbf16, #tpu.memory_space<vmem>>, %arg6: memref<128x32xbf16, #tpu.memory_space<vmem>>, %arg7: memref<16x32xf32, #tpu.memory_space<vmem>>) attributes {dimension_semantics = [#tpu.dimension_semantics<parallel>, #tpu.dimension_semantics<parallel>], iteration_bounds = array<i64: 1, 1>, scalar_prefetch = 0 : i64, scratch_operands = 0 : i64, tpu.core_type = #tpu.core_type<tc>, window_params = [{transform_indices = @transform_0, window_bounds = array<i64: 16, 32>}, {transform_indices = @transform_1, window_bounds = array<i64: 32, 32>}, {transform_indices = @transform_2, window_bounds = array<i64: 1, 32>}, {transform_indices = @transform_3, window_bounds = array<i64: 16, 128>}, {transform_indices = @transform_4, window_bounds = array<i64: 128, 32>}, {transform_indices = @transform_5, window_bounds = array<i64: 16, 32>}]} {
    %c0 = arith.constant 0 : index
    %c0_0 = arith.constant 0 : index
    %0 = vector.load %arg2[%c0, %c0_0] : memref<16x32xbf16, #tpu.memory_space<vmem>>, vector<16x32xbf16>
    %c0_1 = arith.constant 0 : index
    %c0_2 = arith.constant 0 : index
    %1 = vector.load %arg3[%c0_1, %c0_2] : memref<32x32xbf16, #tpu.memory_space<vmem>>, vector<32x32xbf16>
    %cst = arith.constant dense<0.000000e+00> : vector<16x32xf32>
    %2 = tpu.matmul %0, %1, %cst {dimension_numbers = #tpu.dot_dimension_numbers<[1], [0], [0], [1], [0, 0, 1, 1], [], []>} : vector<16x32xbf16>, vector<32x32xbf16>, vector<16x32xf32> -> vector<16x32xf32>
    %c0_3 = arith.constant 0 : index
    %c0_4 = arith.constant 0 : index
    %3 = vector.load %arg5[%c0_3, %c0_4] : memref<16x128xbf16, #tpu.memory_space<vmem>>, vector<16x128xbf16>
    %c0_5 = arith.constant 0 : index
    %c0_6 = arith.constant 0 : index
    %4 = vector.load %arg6[%c0_5, %c0_6] : memref<128x32xbf16, #tpu.memory_space<vmem>>, vector<128x32xbf16>
    %cst_7 = arith.constant dense<0.000000e+00> : vector<16x32xf32>
    %5 = tpu.matmul %3, %4, %cst_7 {dimension_numbers = #tpu.dot_dimension_numbers<[1], [0], [0], [1], [0, 0, 1, 1], [], []>} : vector<16x128xbf16>, vector<128x32xbf16>, vector<16x32xf32> -> vector<16x32xf32>
    %6 = arith.addf %2, %5 : vector<16x32xf32>
    %c0_8 = arith.constant 0 : index
    %c0_9 = arith.constant 0 : index
    %7 = vector.load %arg4[%c0_8, %c0_9] : memref<1x32xf32, #tpu.memory_space<vmem>>, vector<1x32xf32>
    %8 = vector.broadcast %7 : vector<1x32xf32> to vector<16x32xf32>
    %9 = arith.addf %6, %8 : vector<16x32xf32>
    %c0_10 = arith.constant 0 : index
    %c0_11 = arith.constant 0 : index
    %10 = vector.load %arg7[%c0_10, %c0_11] : memref<16x32xf32, #tpu.memory_space<vmem>>, vector<16x32xf32>
    tpu.vector_store %arg7[%c0_10, %c0_11], %9 {strides = array<i32>} : memref<16x32xf32, #tpu.memory_space<vmem>>, vector<16x32xf32>,
    return
  }
  func.func @transform_0(%arg0: i32, %arg1: i32) -> (i32, i32) {
    %c0_i32 = arith.constant 0 : i32
    %c0_i32_0 = arith.constant 0 : i32
    return %arg0, %c0_i32 : i32, i32
  }
  func.func @transform_1(%arg0: i32, %arg1: i32) -> (i32, i32) {
    %c0_i32 = arith.constant 0 : i32
    %c0_i32_0 = arith.constant 0 : i32
    return %c0_i32, %arg1 : i32, i32
  }
  func.func @transform_2(%arg0: i32, %arg1: i32) -> (i32, i32) {
    %c0_i32 = arith.constant 0 : i32
    %c0_i32_0 = arith.constant 0 : i32
    return %c0_i32, %arg1 : i32, i32
  }
  func.func @transform_3(%arg0: i32, %arg1: i32) -> (i32, i32) {
    %c0_i32 = arith.constant 0 : i32
    %c0_i32_0 = arith.constant 0 : i32
    return %arg0, %c0_i32 : i32, i32
  }
  func.func @transform_4(%arg0: i32, %arg1: i32) -> (i32, i32) {
    %c0_i32 = arith.constant 0 : i32
    %c0_i32_0 = arith.constant 0 : i32
    return %c0_i32, %arg1 : i32, i32
  }
  func.func @transform_5(%arg0: i32, %arg1: i32) -> (i32, i32) {
    %c0_i32 = arith.constant 0 : i32
    return %arg0, %arg1 : i32, i32
  }
}

</mosaic_0001>

<bundles_post_ra>
// kernel: tpu_custom_call.1
= control target key start
LH: loop header
LB: loop body
LE: loop exit
PB: predicated region body
PF: predicated region fallthrough
CT: control target
= control target key end

     0   :  { %v325_v1 = vmov 0.0   ;;  %vm326_vm0 = vmmov 0   ;;  %vm158_vm1 = vcmask 261120   ;;  %s414_s0 = inlined_call_operand.vmem [shape: bf16[16,32], index: 0, kind: input, shape index: {}]   ;;  %s415_s1 = inlined_call_operand.vmem [shape: bf16[32,32], index: 1, kind: input, shape index: {}]   ;;  %s416_s2 = inlined_call_operand.vmem [shape: f32[1,32], index: 2, kind: input, shape index: {}]   ;;  %s417_s3 = inlined_call_operand.vmem [shape: bf16[16,128], index: 3, kind: input, shape index: {}]   ;;  %s418_s4 = inlined_call_operand.vmem [shape: bf16[128,32], index: 4, kind: input, shape index: {}]   ;;  %s419_s5 = inlined_call_operand.hbm [shape: f32[16,32], index: 5, kind: output, shape index: {}]  }
   0x1   :  { %v289_v0 = vld [vmem:[%s418_s4] sm:$0xff]   ;;  %256 = vmatprep.subr.bf16.mxu0 %v325_v1  ;;  %276 = vmatprep.subr.bf16.mxu1 %v325_v1  ;;  %v290_v2 = vld [vmem:[%s418_s4 + $0x8] sm:$0xff]   ;;  %v291_v3 = vld [vmem:[%s418_s4 + $0x10] sm:$0xff]  }
   0x2   :  { %257 = vmatpush3.bf16.msra.mxu0 %v289_v0  ;;  %280 = vmatprep.mubr.msk.bf16.mxu1 %vm326_vm0, %v325_v1  ;;  %v295_v4 = vld [vmem:[%s415_s1] sm:$0xff]   ;;  %v297_v5 = vld [vmem:[%s415_s1 + $0x8] sm:$0xff]   ;;  %v292_v6 = vld [vmem:[%s418_s4 + $0x18] sm:$0xff]  }
   0x3   :  { %258 = vmatprep.subr.bf16.mxu0 %v325_v1  ;;  %272 = vmatprep.mubr.msk.bf16.mxu0 %vm326_vm0, %v325_v1  ;;  %v299_v7 = vld [vmem:[%s414_s0] sm:$0xff]  }
   0x4   :  { %277 = vmatpush3.bf16.msra.mxu1 %v295_v4 }
   0x5   :  { %278 = vmatprep.subr.bf16.mxu1 %v325_v1 }
   0x6   :  { %259 = vmatpush3.bf16.msra.mxu0 %v290_v2 }
   0x7   :  { %260 = vmatprep.subr.bf16.mxu0 %v325_v1 }
   0x8   :  { %279 = vmatpush3.bf16.msra.mxu1 %v297_v5 }
   0xa   :  { %261 = vmatpush3.bf16.msra.mxu0 %v291_v3 }
   0xb   :  { %262 = vmatprep.subr.bf16.mxu0 %v325_v1 }
   0xc   :  { %10 = vsyncpa [#allocation3], 0  ;;  %v293_v8 = vld [vmem:[%s418_s4 + $0x20] sm:$0xff]   ;;  %281 = vmatmul.mubr.msk.bf16.vlgmr.msra.gmra.mrb[0].mxu1 %vm158_vm1, %v299_v7  ;;  %v294_v9 = vld [vmem:[%s418_s4 + $0x28] sm:$0xff]   ;;  %s327_s17 = smov [#allocation2]  }
   0xd   :  { %v296_v10 = vld [vmem:[%s418_s4 + $0x30] sm:$0xff]   ;;  %v298_v11 = vld [vmem:[%s418_s4 + $0x38] sm:$0xff]   ;;  %v300_v12 = vld [vmem:[%s417_s3] sm:$0xff]   ;;  %s219_s4 = sshll.u32 %s327_s17, 4  ;;  %s220_s4 = int_to_ptr.vmem [resolvable:$true] %s219_s4 }
   0xe   :  { %263 = vmatpush3.bf16.msra.mxu0 %v292_v6  ;;  %v243_v18 = vld [vmem:[%s416_s2] ss:$0 sm:$0xff]  ;;  %s301_s3 = scalar_lea.vmem %s220_s4, 256  ;;  %p306_p1 = scmp.lt.s32.totalorder %s220_s4, %s220_s4 }
   0xf   :  { %264 = vmatprep.subr.bf16.mxu0 %v325_v1  ;;  %p302_p0 = scmp.ne.s32.totalorder %s220_s4, %s301_s3  ;;  %p307_p2 = scmp.lt.s32.totalorder %s301_s3, %s301_s3 }
  0x11   :  { %p308_p3 = por %p307_p2, %p306_p1 }
  0x12   :  { %265 = vmatpush3.bf16.msra.mxu0 %v293_v8 }
  0x13   :  { %266 = vmatprep.subr.bf16.mxu0 %v325_v1  ;;  %p309_p4 = pnand %p308_p3, %p302_p0 }
  0x16   :  { %267 = vmatpush3.bf16.msra.mxu0 %v294_v9 }
  0x17   :  { %268 = vmatprep.subr.bf16.mxu0 %v325_v1 }
  0x1a   :  { %269 = vmatpush3.bf16.msra.mxu0 %v296_v10 }
  0x1b   :  { %270 = vmatprep.subr.bf16.mxu0 %v325_v1 }
  0x1e   :  { %271 = vmatpush3.bf16.msra.mxu0 %v298_v11 }
  0x21   :  { %273 = vmatmul.mubr.bf16.vlgmr.msra.gmra.mrb[0].mxu0 %v300_v12 }
  0xdf   :  { %v196_v13 = vpop.f32.mrb[0].mxu1 }
  0xe0   :  { %v282_v14 = vpop.f32.mrb[1].mxu1 }
  0xe1   :  { %v199_v15 = vpop.f32.mrb[2].mxu1 }
  0xe2   :  { %v283_v16 = vpop.f32.mrb[3].mxu1 }
  0xf4   :  { %v134_v17 = vpop.f32.mrb[0].mxu0 }
  0xf5   :  { %v197_v19 = vadd.f32 %v196_v13, %v134_v17  ;;  %v274_v20 = vpop.f32.mrb[1].mxu0 }
  0xf6   :  { %v137_v21 = vpop.f32.mrb[2].mxu0 }
  0xf7   :  { %v210_v22 = vadd.f32 %v243_v18, %v197_v19  ;;  %v200_v23 = vadd.f32 %v199_v15, %v137_v21  ;;  %v275_v24 = vpop.f32.mrb[3].mxu0 }
  0xf9   :  { %212 = vst.msk [vmem:[#allocation2] sm:$0xff] %vm158_vm1, %v210_v22  ;;  %v211_v25 = vadd.f32 %v243_v18, %v200_v23 }
  0xfb   :  { %213 = vst.msk [vmem:[#allocation2 + $0x8] sm:$0xff] %vm158_vm1, %v211_v25 }
  0xfc   :  { %312 = shalt.err (!%p309_p4)
}
  0xfd   :  { %s313_s19 = scalar_lea.hbm %s419_s5, 256 }
  0xfe   :  { %p314_p5 = scmp.ne.s32.totalorder %s419_s5, %s313_s19  ;;  %p317_p6 = scmp.lt.u32.totalorder %s313_s19, %s419_s5 }
 0x100   :  { %p319_p7 = pnand %p317_p6, %p314_p5 }
 0x102   :  { %322 = shalt.err (!%p319_p7)
}
 0x103   :  { %s328_s24 = smov 128   ;;  %s329_s25 = smov 8  }
 0x104   :  { %225 = dma.vmem_to_hbm [thread:$0]  %s220_s4, 256, %s419_s5, [#allocation3], %s328_s24, %s328_s24, %s329_s25  }
 0x105   :  { %323 = dma.done.wait [#allocation3], 256  }
 0x106   :  { %324 = vsyncadd [#allocation3], 4294967040 }
 0x107   :  { %229 = vsyncpa [#allocation3], 1 }

</bundles_post_ra>
